<compile_context>
chip_gen: v6e
topology: v6e:2x2x1
jax: 0.10.0
libtpu: 0.0.40
codegen_flags: <defaults>
</compile_context>

<pallas_src>
import math

import jax
import jax.numpy as jnp
from jax.experimental import pallas as pl
from jax.experimental.pallas import tpu as pltpu

D_MODEL = 32
SEQ = 8
BATCH = 2
MAX_LENGTH = 5000


def make_pe_table(d_model: int, max_length: int) -> jnp.ndarray:
    """Matches the PyTorch buffer: pe[:, 0::2]=sin(k*div), pe[:, 1::2]=cos(k*div)."""
    assert d_model % 2 == 0, "interleaved sin/cos layout assumes even d_model"
    k = jnp.arange(max_length, dtype=jnp.float32)[:, None]                 # (L, 1)
    div = jnp.exp(jnp.arange(0, d_model, 2, dtype=jnp.float32)
                  * (-math.log(10000.0) / d_model))                        # (D/2,)
    ang = k * div                                                          # (L, D/2)
    pe = jnp.stack([jnp.sin(ang), jnp.cos(ang)], axis=-1)                  # (L, D/2, 2)
    return pe.reshape(max_length, d_model)                                 # (L, D)


def _pe_add_kernel(x_ref, pe_ref, out_ref):
    # x_ref: (TB, S*D) input dtype, pe_ref: (1, S*D) f32, out_ref: (TB, S*D).
    # Add in f32 (matches torch: f32 buffer added to x), cast on store.
    # Dropout is identity (eval-mode semantics).
    x = x_ref[...].astype(jnp.float32)
    out_ref[...] = (x + pe_ref[...]).astype(out_ref.dtype)


def _choose_batch_tile(batch: int, row_bytes: int,
                       vmem_budget_bytes: int = 8 << 20) -> int:
    """Rows per grid step: big enough to amortize per-step overhead (~0.35 us),
    small enough that double-buffered x + out tiles stay far under the scoped
    VMEM default on every generation (v7x: 32 MiB scoped / 64 MiB physical).
    Prefers multiples of 8 rows (full sublane occupancy) that divide batch."""
    max_rows = max(1, vmem_budget_bytes // (4 * max(row_bytes, 1)))
    if batch <= max_rows:
        return batch
    tb = (max_rows // 8) * 8
    while tb >= 8 and batch % tb != 0:
        tb -= 8
    if tb >= 8:
        return tb
    tb = min(max_rows, batch)
    while batch % tb != 0:
        tb -= 1
    return tb


def make_positional_encoding(d_model: int, max_length: int = MAX_LENGTH):
    """Returns a jitted callable x -> x + pe[:, :seq_len] (dropout = identity).

    The PE buffer is built once here (register_buffer analogue); the per-call
    slice/cast is inside the jit and constant-folded, so the per-call path is
    just the Pallas kernel.
    """
    pe_table = make_pe_table(d_model, max_length)          # (L, D) f32, built once

    @jax.jit
    def apply(x: jnp.ndarray) -> jnp.ndarray:
        batch, seq, dim = x.shape
        assert dim == d_model, f"expected d_model={d_model}, got {dim}"
        assert seq <= max_length, f"seq_len {seq} > max_length {max_length}"

        # Lane-dense flattened slab: (B, S*D); last dim (256 here) is a
        # multiple of 128 -> unmasked, full-width vector stores.
        x2 = x.reshape(batch, seq * dim)
        pe2 = pe_table[:seq].reshape(1, seq * dim)          # stays f32

        row_bytes = seq * dim * jnp.dtype(x.dtype).itemsize
        tb = _choose_batch_tile(batch, row_bytes)
        grid = (batch // tb,)

        out2 = pl.pallas_call(
            _pe_add_kernel,
            out_shape=jax.ShapeDtypeStruct((batch, seq * dim), x.dtype),
            grid=grid,
            in_specs=[
                # x tile: TB batch rows per grid step.
                pl.BlockSpec((tb, seq * dim), lambda b: (b, 0)),
                # PE slab: index_map ignores the grid index -> DMA'd once,
                # VMEM-resident across every batch tile.
                pl.BlockSpec((1, seq * dim), lambda b: (0, 0)),
            ],
            out_specs=pl.BlockSpec((tb, seq * dim), lambda b: (b, 0)),
            # In-place add on x's buffer: no separate output HBM allocation.
            input_output_aliases={0: 0},
            compiler_params=pltpu.CompilerParams(
                dimension_semantics=("parallel",)),
        )(x2, pe2)
        return out2.reshape(batch, seq, dim)

    return apply


# TODO(synk): training-mode dropout (stateful pltpu.prng_* masking) is not
# implemented; the forward matches the PyTorch module in eval mode (identity).


if __name__ == "__main__":
    key = jax.random.PRNGKey(0)
    x = jax.random.normal(key, (BATCH, SEQ, D_MODEL), dtype=jnp.float32)

    positional_encoding = make_positional_encoding(D_MODEL, MAX_LENGTH)

    out = positional_encoding(x)
    jax.block_until_ready(out)

    # Pure-JAX reference mirroring the PyTorch forward (dropout = identity).
    pe_table = make_pe_table(D_MODEL, MAX_LENGTH)
    ref = x + pe_table[None, :SEQ, :]
    max_err = float(jnp.max(jnp.abs(out - ref)))
    assert jnp.allclose(out, ref, atol=1e-6, rtol=1e-6), max_err
    print("KERNEL_OK")
</pallas_src>

<mosaic_0001>
module attributes {stable_mosaic.version = 11 : i64} {
  func.func @_pe_add_kernel(%arg0: i32, %arg1: memref<2x256xf32, #tpu.memory_space<vmem>>, %arg2: memref<1x256xf32, #tpu.memory_space<vmem>>, %arg3: memref<2x256xf32, #tpu.memory_space<vmem>>) attributes {dimension_semantics = [#tpu.dimension_semantics<parallel>], iteration_bounds = array<i64: 1>, scalar_prefetch = 0 : i64, scratch_operands = 0 : i64, tpu.core_type = #tpu.core_type<tc>, window_params = [{transform_indices = @transform_0, window_bounds = array<i64: 2, 256>}, {pipeline_mode = #tpu.pipeline_mode<synchronous>, transform_indices = @transform_1, window_bounds = array<i64: 1, 256>}, {transform_indices = @transform_2, window_bounds = array<i64: 2, 256>}]} {
    %c0 = arith.constant 0 : index
    %c0_0 = arith.constant 0 : index
    %0 = vector.load %arg1[%c0, %c0_0] : memref<2x256xf32, #tpu.memory_space<vmem>>, vector<2x256xf32>
    %c0_1 = arith.constant 0 : index
    %c0_2 = arith.constant 0 : index
    %1 = vector.load %arg2[%c0_1, %c0_2] : memref<1x256xf32, #tpu.memory_space<vmem>>, vector<1x256xf32>
    %2 = vector.broadcast %1 : vector<1x256xf32> to vector<2x256xf32>
    %3 = arith.addf %0, %2 : vector<2x256xf32>
    %c0_3 = arith.constant 0 : index
    %c0_4 = arith.constant 0 : index
    %4 = vector.load %arg3[%c0_3, %c0_4] : memref<2x256xf32, #tpu.memory_space<vmem>>, vector<2x256xf32>
    tpu.vector_store %arg3[%c0_3, %c0_4], %3 {strides = array<i32>} : memref<2x256xf32, #tpu.memory_space<vmem>>, vector<2x256xf32>,
    return
  }
  func.func @transform_0(%arg0: i32) -> (i32, i32) {
    %c0_i32 = arith.constant 0 : i32
    %c0_i32_0 = arith.constant 0 : i32
    return %arg0, %c0_i32 : i32, i32
  }
  func.func @transform_1(%arg0: i32) -> (i32, i32) {
    %c0_i32 = arith.constant 0 : i32
    %c0_i32_0 = arith.constant 0 : i32
    %c0_i32_1 = arith.constant 0 : i32
    return %c0_i32, %c0_i32_0 : i32, i32
  }
  func.func @transform_2(%arg0: i32) -> (i32, i32) {
    %c0_i32 = arith.constant 0 : i32
    %c0_i32_0 = arith.constant 0 : i32
    return %arg0, %c0_i32 : i32, i32
  }
}

</mosaic_0001>

<bundles_post_ra>
// kernel: apply.1
= control target key start
LH: loop header
LB: loop body
LE: loop exit
PB: predicated region body
PF: predicated region fallthrough
CT: control target
= control target key end

     0   :  { %v14_v0 = vlaneseq  ;;  %v38_v1 = vmov 1983009808   ;;  %s63_s1 = inlined_call_operand.vmem [shape: f32[1,256], index: 1, kind: input, shape index: {}]   ;;  %s64_s0 = inlined_call_operand.vmem [shape: f32[2,256], index: 0, kind: input, shape index: {}, may-alias: {0,2}]   ;;  %s65_s2 = inlined_call_operand.vmem [shape: f32[2,256], index: 2, kind: output, shape index: {}, may-alias: {0,2}]  }
   0x1   :  { %v24_v2 = vunpack.c.l.s4 %v38_v1  ;;  %v12_v4 = vld [vmem:[%s63_s1] sm:$0x3] }
   0x2   :  { %v15_v3 = vshrl.u32 %v14_v0, 7  ;;  %v11_v12 = vld [vmem:[%s64_s0] sm:$0xf] }
   0x3   :  { %v25_v5 = vunpack.c.0.s8 %v24_v2 }
   0x4   :  { %v16_v6 = vsub.s32 0, %v15_v3  ;;  %v20_v7 = vsub.s32 1, %v15_v3 }
   0x5   :  { %v28_v10 = vsub.s32 %v25_v5, %v15_v3 }
   0x6   :  { %v17_v8 = vrot.slane %v12_v4, %v16_v6  ;;  %v21_v9 = vrot.slane %v12_v4, %v20_v7 }
   0x8   :  { %v22_v11 = vcombine.low %v17_v8, %v21_v9 }
   0xa   :  { %v29_v13 = vrot.slane %v22_v11, %v28_v10 }
   0xc   :  { %v31_v14 = vadd.f32 %v29_v13, %v11_v12 }
   0xe   :  { %32 = vst [vmem:[%s65_s2] sm:$0xf] %v31_v14 }

</bundles_post_ra>
